<compile_context>
chip_gen: v7x
topology: tpu7x:2x2x1
jax: 0.10.0
libtpu: 0.0.40
codegen_flags: <defaults>
</compile_context>

<pallas_src>
import functools

import jax
import jax.numpy as jnp
from jax.experimental import pallas as pl
from jax.experimental.pallas import tpu as pltpu


def _round_up(x: int, m: int) -> int:
    return (x + m - 1) // m * m


def _pad_to(arr, shape):
    pads = [(0, t - s) for s, t in zip(arr.shape, shape)]
    return jnp.pad(arr, pads)


def _pick_tile(n_pad: int, cap: int) -> int:
    """Largest multiple of 128 that divides n_pad and is <= cap."""
    cap = min(cap, n_pad)
    best = 128
    t = 128
    while t <= cap:
        if n_pad % t == 0:
            best = t
        t += 128
    return best


def _default_vmem_limit() -> int:
    """<= half of physical VMEM: ~32 MiB on v7x (64 MiB), ~64 MiB on v5e/v6e (128 MiB)."""
    try:
        cap = int(pltpu.get_tpu_info().vmem_capacity_bytes)
    except Exception:
        cap = 64 * 1024 * 1024
    return min(cap // 2, 96 * 1024 * 1024)


# ---------------------------------------------------------------------------
# Kernels
# ---------------------------------------------------------------------------

def _layer_kernel_plain(adj_ref, y_ref, b_ref, out_ref, acc_ref, *,
                        apply_relu: bool, feat_resident: bool, tk: int):
    """out = act(adj @ y + b); y already contains the weight (x @ W)."""
    k = pl.program_id(1)

    @pl.when(k == 0)
    def _init():
        acc_ref[...] = jnp.zeros_like(acc_ref)

    if feat_resident:
        row = pl.multiple_of(k * tk, 128)
        y_tile = y_ref[pl.ds(row, tk), :]
    else:
        y_tile = y_ref[...]

    # Pure MXU accumulate of (adj tile) @ (feature tile) in f32.
    acc_ref[...] += jnp.dot(adj_ref[...], y_tile,
                            preferred_element_type=jnp.float32)

    @pl.when(k == pl.num_programs(1) - 1)
    def _finalize():
        h = acc_ref[...] + b_ref[...]
        if apply_relu:
            h = jnp.maximum(h, 0.0)
        out_ref[...] = h.astype(out_ref.dtype)


def _layer_kernel_fused(adj_ref, x_ref, w_ref, b_ref, out_ref, acc_ref, *,
                        apply_relu: bool, feat_resident: bool, tk: int):
    """out = act((adj @ x) @ W + b); W applied once per row tile at finalize."""
    k = pl.program_id(1)

    @pl.when(k == 0)
    def _init():
        acc_ref[...] = jnp.zeros_like(acc_ref)

    if feat_resident:
        row = pl.multiple_of(k * tk, 128)
        x_tile = x_ref[pl.ds(row, tk), :]
    else:
        x_tile = x_ref[...]

    acc_ref[...] += jnp.dot(adj_ref[...], x_tile,
                            preferred_element_type=jnp.float32)

    @pl.when(k == pl.num_programs(1) - 1)
    def _finalize():
        h = jnp.dot(acc_ref[...].astype(w_ref.dtype), w_ref[...],
                    preferred_element_type=jnp.float32) + b_ref[...]
        if apply_relu:
            h = jnp.maximum(h, 0.0)
        out_ref[...] = h.astype(out_ref.dtype)


# ---------------------------------------------------------------------------
# Layer wrapper
# ---------------------------------------------------------------------------

def _gcn_layer(adj_p, feat_p, b_p, *, w_p=None, apply_relu, out_dtype,
               tm, tk, feat_resident, vmem_limit):
    n_pad = adj_p.shape[0]
    f_feat = feat_p.shape[1]
    f_out = b_p.shape[1]
    assert n_pad % tm == 0 and n_pad % tk == 0, "tiles must divide padded N"
    grid = (n_pad // tm, n_pad // tk)

    adj_spec = pl.BlockSpec((tm, tk), lambda i, k: (i, k))
    if feat_resident:
        # Whole feature matrix resident in VMEM (constant block index -> one DMA).
        feat_spec = pl.BlockSpec((n_pad, f_feat), lambda i, k: (0, 0))
    else:
        feat_spec = pl.BlockSpec((tk, f_feat), lambda i, k: (k, 0))
    b_spec = pl.BlockSpec((1, f_out), lambda i, k: (0, 0))
    out_spec = pl.BlockSpec((tm, f_out), lambda i, k: (i, 0))

    if w_p is None:
        kernel = functools.partial(_layer_kernel_plain, apply_relu=apply_relu,
                                   feat_resident=feat_resident, tk=tk)
        in_specs = [adj_spec, feat_spec, b_spec]
        args = (adj_p, feat_p, b_p)
        acc_shape = (tm, f_out)
    else:
        kernel = functools.partial(_layer_kernel_fused, apply_relu=apply_relu,
                                   feat_resident=feat_resident, tk=tk)
        w_spec = pl.BlockSpec(w_p.shape, lambda i, k: (0, 0))  # resident weights
        in_specs = [adj_spec, feat_spec, w_spec, b_spec]
        args = (adj_p, feat_p, w_p, b_p)
        acc_shape = (tm, f_feat)

    return pl.pallas_call(
        kernel,
        out_shape=jax.ShapeDtypeStruct((n_pad, f_out), out_dtype),
        grid_spec=pltpu.PrefetchScalarGridSpec(
            num_scalar_prefetch=0,
            grid=grid,
            in_specs=in_specs,
            out_specs=out_spec,
            scratch_shapes=[pltpu.VMEM(acc_shape, jnp.float32)],
        ),
        compiler_params=pltpu.CompilerParams(
            dimension_semantics=("parallel", "arbitrary"),
            vmem_limit_bytes=int(vmem_limit),
        ),
    )(*args)


# ---------------------------------------------------------------------------
# Full forward
# ---------------------------------------------------------------------------

def gcn_forward(adj, x, w1, b1, w2, b2, *,
                block_m=1024, block_k=1024, compute_dtype=jnp.bfloat16):
    """GCN forward pass.

    adj: [N, N]; x: [N, Din];
    w1: [H, Din], b1: [H]; w2: [Dout, H], b2: [Dout]  (PyTorch nn.Linear layout).
    Returns [N, Dout] float32.
    """
    n = adj.shape[0]
    d_in = x.shape[1]
    hidden = w1.shape[0]
    d_out = w2.shape[0]

    # Pad N to a multiple of 128 only; pick tiles as divisors of n_pad (no grid
    # truncation possible, no quadratic padding waste).
    n_pad = _round_up(n, 128)
    tm = _pick_tile(n_pad, block_m)
    tk = _pick_tile(n_pad, block_k)
    # v7x megacore: prefer >=2 row tiles so the "parallel" axis splits across both TCs.
    if n_pad // tm < 2 and n_pad >= 256:
        tm = _pick_tile(n_pad, n_pad // 2)

    d_in_p = _round_up(d_in, 128)
    hidden_p = _round_up(hidden, 128)
    d_out_p = _round_up(d_out, 128)

    vmem_limit = _default_vmem_limit()

    def _resident(width_p):
        # Keep the streamed feature VMEM-resident when it is comfortably small
        # (budget sized so it also fits v7x's 64 MiB physical VMEM alongside
        # double-buffered adjacency tiles, accumulator and output).
        return n_pad * width_p * 2 <= 8 * 1024 * 1024

    # Adjacency: cast+pad to bf16 ONCE, reused by both layers (halves per-layer
    # adjacency HBM reads; padded rows/cols are zero so real rows stay exact).
    adj_p = _pad_to(adj.astype(compute_dtype), (n_pad, n_pad))

    # ---- Layer 1: h = relu((adj @ x) @ W1^T + b1) ----
    b1_p = _pad_to(b1.astype(jnp.float32).reshape(1, hidden), (1, hidden_p))
    if hidden_p <= d_in_p:
        # Reorder to adj @ (x @ W1^T): stream the narrower operand, one bf16 rounding.
        y1 = jnp.dot(x, w1.T, preferred_element_type=jnp.float32)     # [N, H], tiny
        y1_p = _pad_to(y1.astype(compute_dtype), (n_pad, hidden_p))
        h_p = _gcn_layer(adj_p, y1_p, b1_p, w_p=None, apply_relu=True,
                         out_dtype=compute_dtype, tm=tm, tk=tk,
                         feat_resident=_resident(hidden_p), vmem_limit=vmem_limit)
    else:
        x_p = _pad_to(x.astype(compute_dtype), (n_pad, d_in_p))
        w1_p = _pad_to(w1.T.astype(compute_dtype), (d_in_p, hidden_p))
        h_p = _gcn_layer(adj_p, x_p, b1_p, w_p=w1_p, apply_relu=True,
                         out_dtype=compute_dtype, tm=tm, tk=tk,
                         feat_resident=_resident(d_in_p), vmem_limit=vmem_limit)

    # NOTE: padded node rows of h_p equal relu(b1) != 0; harmless because the
    # matching adjacency columns are zero and padded output rows are sliced off.

    # ---- Layer 2: out = (adj @ h) @ W2^T + b2 ----
    b2_p = _pad_to(b2.astype(jnp.float32).reshape(1, d_out), (1, d_out_p))
    w2_p = _pad_to(w2.T.astype(compute_dtype), (hidden_p, d_out_p))
    if d_out_p <= hidden_p:
        y2 = jnp.dot(h_p, w2_p, preferred_element_type=jnp.float32)    # [N_pad, Dout_p]
        y2_p = y2.astype(compute_dtype)
        out_p = _gcn_layer(adj_p, y2_p, b2_p, w_p=None, apply_relu=False,
                           out_dtype=jnp.float32, tm=tm, tk=tk,
                           feat_resident=_resident(d_out_p), vmem_limit=vmem_limit)
    else:
        out_p = _gcn_layer(adj_p, h_p, b2_p, w_p=w2_p, apply_relu=False,
                           out_dtype=jnp.float32, tm=tm, tk=tk,
                           feat_resident=_resident(hidden_p), vmem_limit=vmem_limit)

    return out_p[:n, :d_out]


def gcn_reference(adj, x, w1, b1, w2, b2):
    h = jnp.maximum(adj @ x @ w1.T + b1, 0.0)
    return adj @ h @ w2.T + b2


if __name__ == "__main__":
    # Small, deterministic problem: 16 nodes, input_dim=8, hidden_dim=32, output_dim=16.
    N, D_IN, HIDDEN, D_OUT = 16, 8, 32, 16

    key = jax.random.PRNGKey(0)
    k_adj, k_x, k_w1, k_b1, k_w2, k_b2 = jax.random.split(key, 6)

    # Symmetric adjacency (values only matter for determinism).
    a = jax.random.uniform(k_adj, (N, N), dtype=jnp.float32)
    adj = (a + a.T) * 0.5

    x = jax.random.normal(k_x, (N, D_IN), dtype=jnp.float32)

    # PyTorch nn.Linear layout: weight [out_features, in_features], bias [out_features].
    w1 = jax.random.normal(k_w1, (HIDDEN, D_IN), dtype=jnp.float32) * 0.1
    b1 = jax.random.normal(k_b1, (HIDDEN,), dtype=jnp.float32) * 0.1
    w2 = jax.random.normal(k_w2, (D_OUT, HIDDEN), dtype=jnp.float32) * 0.1
    b2 = jax.random.normal(k_b2, (D_OUT,), dtype=jnp.float32) * 0.1

    out = gcn_forward(adj, x, w1, b1, w2, b2)
    jax.block_until_ready(out)

    ref = gcn_reference(adj, x, w1, b1, w2, b2)
    assert out.shape == (N, D_OUT)
    # bf16 MXU inputs with f32 accumulation -> loose-ish tolerance vs f32 reference.
    max_err = float(jnp.max(jnp.abs(out - ref)))
    assert jnp.allclose(out, ref, atol=5e-2, rtol=5e-2), \
        f"mismatch vs reference (max_err={max_err})"

    print("KERNEL_OK")
</pallas_src>

<mosaic_0001>
module attributes {stable_mosaic.version = 11 : i64} {
  func.func @_layer_kernel_plain(%arg0: i32, %arg1: i32, %arg2: memref<128x128xbf16, #tpu.memory_space<vmem>>, %arg3: memref<128x128xbf16, #tpu.memory_space<vmem>>, %arg4: memref<1x128xf32, #tpu.memory_space<vmem>>, %arg5: memref<128x128xbf16, #tpu.memory_space<vmem>>, %arg6: memref<128x128xf32, #tpu.memory_space<vmem>>) attributes {dimension_semantics = [#tpu.dimension_semantics<parallel>, #tpu.dimension_semantics<arbitrary>], iteration_bounds = array<i64: 1, 1>, scalar_prefetch = 0 : i64, scratch_operands = 1 : i64, tpu.core_type = #tpu.core_type<tc>, window_params = [{transform_indices = @transform_0, window_bounds = array<i64: 128, 128>}, {pipeline_mode = #tpu.pipeline_mode<synchronous>, transform_indices = @transform_1, window_bounds = array<i64: 128, 128>}, {pipeline_mode = #tpu.pipeline_mode<synchronous>, transform_indices = @transform_2, window_bounds = array<i64: 1, 128>}, {transform_indices = @transform_3, window_bounds = array<i64: 128, 128>}]} {
    %c0_i32 = arith.constant 0 : i32
    %0 = arith.cmpi eq, %arg1, %c0_i32 : i32
    %1 = arith.extui %0 : i1 to i32
    %c0_i32_0 = arith.constant 0 : i32
    %2 = arith.cmpi ne, %1, %c0_i32_0 : i32
    scf.if %2 {
      %cst_9 = arith.constant 0.000000e+00 : f32
      %15 = vector.broadcast %cst_9 : f32 to vector<128x128xf32>
      %c0_10 = arith.constant 0 : index
      %c0_11 = arith.constant 0 : index
      %16 = vector.load %arg6[%c0_10, %c0_11] : memref<128x128xf32, #tpu.memory_space<vmem>>, vector<128x128xf32>
      tpu.vector_store %arg6[%c0_10, %c0_11], %15 {strides = array<i32>} : memref<128x128xf32, #tpu.memory_space<vmem>>, vector<128x128xf32>,
    } else {
    }
    %c128_i32 = arith.constant 128 : i32
    %3 = arith.muli %arg1, %c128_i32 : i32
    %4 = tpu.assume_multiple %3, 128 : i32
    %5 = arith.index_cast %4 : i32 to index
    %c0 = arith.constant 0 : index
    %6 = vector.load %arg3[%5, %c0] : memref<128x128xbf16, #tpu.memory_space<vmem>>, vector<128x128xbf16>
    %c0_1 = arith.constant 0 : index
    %c0_2 = arith.constant 0 : index
    %7 = vector.load %arg6[%c0_1, %c0_2] : memref<128x128xf32, #tpu.memory_space<vmem>>, vector<128x128xf32>
    %c0_3 = arith.constant 0 : index
    %c0_4 = arith.constant 0 : index
    %8 = vector.load %arg2[%c0_3, %c0_4] : memref<128x128xbf16, #tpu.memory_space<vmem>>, vector<128x128xbf16>
    %cst = arith.constant dense<0.000000e+00> : vector<128x128xf32>
    %9 = tpu.matmul %8, %6, %cst {dimension_numbers = #tpu.dot_dimension_numbers<[1], [0], [0], [1], [0, 0, 1, 1], [], []>} : vector<128x128xbf16>, vector<128x128xbf16>, vector<128x128xf32> -> vector<128x128xf32>
    %10 = arith.addf %7, %9 : vector<128x128xf32>
    %c0_5 = arith.constant 0 : index
    %c0_6 = arith.constant 0 : index
    %11 = vector.load %arg6[%c0_5, %c0_6] : memref<128x128xf32, #tpu.memory_space<vmem>>, vector<128x128xf32>
    tpu.vector_store %arg6[%c0_5, %c0_6], %10 {strides = array<i32>} : memref<128x128xf32, #tpu.memory_space<vmem>>, vector<128x128xf32>,
    %c0_i32_7 = arith.constant 0 : i32
    %12 = arith.cmpi eq, %arg1, %c0_i32_7 : i32
    %13 = arith.extui %12 : i1 to i32
    %c0_i32_8 = arith.constant 0 : i32
    %14 = arith.cmpi ne, %13, %c0_i32_8 : i32
    scf.if %14 {
      %c0_9 = arith.constant 0 : index
      %c0_10 = arith.constant 0 : index
      %15 = vector.load %arg6[%c0_9, %c0_10] : memref<128x128xf32, #tpu.memory_space<vmem>>, vector<128x128xf32>
      %c0_11 = arith.constant 0 : index
      %c0_12 = arith.constant 0 : index
      %16 = vector.load %arg4[%c0_11, %c0_12] : memref<1x128xf32, #tpu.memory_space<vmem>>, vector<1x128xf32>
      %17 = vector.broadcast %16 : vector<1x128xf32> to vector<128x128xf32>
      %18 = arith.addf %15, %17 : vector<128x128xf32>
      %cst_13 = arith.constant 0.000000e+00 : f32
      %19 = vector.broadcast %cst_13 : f32 to vector<128x128xf32>
      %20 = arith.maximumf %18, %19 : vector<128x128xf32>
      %21 = arith.truncf %20 : vector<128x128xf32> to vector<128x128xbf16>
      %c0_14 = arith.constant 0 : index
      %c0_15 = arith.constant 0 : index
      %22 = vector.load %arg5[%c0_14, %c0_15] : memref<128x128xbf16, #tpu.memory_space<vmem>>, vector<128x128xbf16>
      tpu.vector_store %arg5[%c0_14, %c0_15], %21 {strides = array<i32>} : memref<128x128xbf16, #tpu.memory_space<vmem>>, vector<128x128xbf16>,
    } else {
    }
    return
  }
  func.func @transform_0(%arg0: i32, %arg1: i32) -> (i32, i32) {
    %c0_i32 = arith.constant 0 : i32
    return %arg0, %arg1 : i32, i32
  }
  func.func @transform_1(%arg0: i32, %arg1: i32) -> (i32, i32) {
    %c0_i32 = arith.constant 0 : i32
    %c0_i32_0 = arith.constant 0 : i32
    %c0_i32_1 = arith.constant 0 : i32
    return %c0_i32, %c0_i32_0 : i32, i32
  }
  func.func @transform_2(%arg0: i32, %arg1: i32) -> (i32, i32) {
    %c0_i32 = arith.constant 0 : i32
    %c0_i32_0 = arith.constant 0 : i32
    %c0_i32_1 = arith.constant 0 : i32
    return %c0_i32, %c0_i32_0 : i32, i32
  }
  func.func @transform_3(%arg0: i32, %arg1: i32) -> (i32, i32) {
    %c0_i32 = arith.constant 0 : i32
    %c0_i32_0 = arith.constant 0 : i32
    return %arg0, %c0_i32 : i32, i32
  }
}

</mosaic_0001>

<bundles_post_ra>
// kernel: tpu_custom_call.1
= control target key start
LH: loop header
LB: loop body
LE: loop exit
PB: predicated region body
PF: predicated region fallthrough
CT: control target
= control target key end

     0   :  { %8 = vsyncpa [#allocation4], 0  ;;  %s826_s0 = inlined_call_operand.hbm [shape: bf16[128,128], index: 0, kind: input, shape index: {}]   ;;  %s827_s1 = inlined_call_operand.hbm [shape: bf16[128,128], index: 1, kind: input, shape index: {}]   ;;  %s828_s2 = inlined_call_operand.vmem [shape: f32[1,128], index: 2, kind: input, shape index: {}]   ;;  %s829_s3 = inlined_call_operand.hbm [shape: bf16[128,128], index: 3, kind: output, shape index: {}]  }
   0x1   :  { %9 = vsyncpa [#allocation7], 0 }
   0x2   :  { %10 = vsyncpa [#allocation5], 0  ;;  %s753_s12 = smov [#allocation3]   ;;  %s681_s16 = scalar_lea.hbm %s826_s0, 1024 }
   0x3   :  { %s16_s13 = sshll.u32 %s753_s12, 4  ;;  %p682_p0 = scmp.ne.s32.totalorder %s826_s0, %s681_s16  ;;  %s17_s13 = int_to_ptr.vmem [resolvable:$true] %s16_s13 }
   0x4   :  { %p685_p1 = scmp.lt.u32.totalorder %s681_s16, %s826_s0 }
   0x6   :  { %p687_p2 = pnand %p685_p1, %p682_p0 }
   0x8   :  { %690 = shalt.err (!%p687_p2)
}
   0x9   :  { %s691_s21 = scalar_lea.vmem %s17_s13, 1024  ;;  %p696_p4 = scmp.lt.s32.totalorder %s17_s13, %s17_s13 }
   0xa   :  { %p692_p3 = scmp.ne.s32.totalorder %s17_s13, %s691_s21  ;;  %p697_p5 = scmp.lt.s32.totalorder %s691_s21, %s691_s21 }
   0xc   :  { %p698_p6 = por %p697_p5, %p696_p4 }
   0xe   :  { %p699_p7 = pnand %p698_p6, %p692_p3 }
  0x10   :  { %702 = shalt.err (!%p699_p7)
}
  0x11   :  { %s754_s22 = smov 64   ;;  %s755_s23 = smov 4  }
  0x12   :  { %22 = dma.hbm_to_vmem [thread:$0]  %s826_s0, 1024, %s17_s13, [#allocation4], %s754_s22, %s754_s22, %s755_s23  }
  0x13   :  { %s756_s26 = smov [#allocation6]   ;;  %s703_s30 = scalar_lea.hbm %s827_s1, 1024 }
  0x14   :  { %s28_s27 = sshll.u32 %s756_s26, 4  ;;  %p704_p8 = scmp.ne.s32.totalorder %s827_s1, %s703_s30  ;;  %s29_s27 = int_to_ptr.vmem [resolvable:$true] %s28_s27 }
  0x15   :  { %p707_p9 = scmp.lt.u32.totalorder %s703_s30, %s827_s1 }
  0x17   :  { %p709_p10 = pnand %p707_p9, %p704_p8 }
  0x19   :  { %712 = shalt.err (!%p709_p10)
}
  0x1a   :  { %s713_s8 = scalar_lea.vmem %s29_s27, 1024  ;;  %p718_p12 = scmp.lt.s32.totalorder %s29_s27, %s29_s27 }
  0x1b   :  { %p714_p11 = scmp.ne.s32.totalorder %s29_s27, %s713_s8  ;;  %p719_p13 = scmp.lt.s32.totalorder %s713_s8, %s713_s8 }
  0x1d   :  { %p720_p0 = por %p719_p13, %p718_p12 }
  0x1f   :  { %p721_p1 = pnand %p720_p0, %p714_p11 }
  0x21   :  { %724 = shalt.err (!%p721_p1)
}
  0x22   :  { %34 = dma.hbm_to_vmem [thread:$0]  %s827_s1, 1024, %s29_s27, [#allocation7], %s754_s22, %s754_s22, %s755_s23  }
  0x23   :  { %747 = dma.done.wait [#allocation4], 1024  }
  0x24   :  { %748 = vsyncadd [#allocation4], 4294966272 }
  0x25   :  { %749 = dma.done.wait [#allocation7], 1024  }
  0x26   :  { %750 = vsyncadd [#allocation7], 4294966272  ;;  %v665_v0 = vld [vmem:[#allocation6] sm:$0xff]   ;;  %v666_v1 = vld [vmem:[#allocation6 + $0x8] sm:$0xff]  }
  0x27   :  { %612 = vmatprep.subr.bf16.mxu0 %v665_v0  ;;  %644 = vmatprep.subr.bf16.mxu1 %v665_v0  ;;  %v667_v2 = vld [vmem:[#allocation6 + $0x10] sm:$0xff]   ;;  %v668_v3 = vld [vmem:[#allocation6 + $0x18] sm:$0xff]   ;;  %v673_v4 = vld [vmem:[#allocation3] sm:$0xff]  }
  0x28   :  { %613 = vmatpush3.bf16.msra.mxu0 %v665_v0  ;;  %652 = vmatpush3.bf16.msra.mxu1 %v665_v0  ;;  %v674_v5 = vld [vmem:[#allocation3 + $0x20] sm:$0xff]   ;;  %v670_v7 = vld [vmem:[#allocation6 + $0x28] sm:$0xff]   ;;  %v671_v8 = vld [vmem:[#allocation6 + $0x30] sm:$0xff]  }
  0x29   :  { %614 = vmatprep.subr.bf16.mxu0 %v666_v1  ;;  %645 = vmatprep.subr.bf16.mxu1 %v666_v1  ;;  %v669_v6 = vld [vmem:[#allocation6 + $0x20] sm:$0xff]   ;;  %v672_v9 = vld [vmem:[#allocation6 + $0x38] sm:$0xff]   ;;  %v675_v10 = vld [vmem:[#allocation3 + $0x8] sm:$0xff]  }
  0x2a   :  { %628 = vmatprep.mubr.bf16.mxu0 %v673_v4  ;;  %636 = vmatprep.mubr.bf16.mxu1 %v674_v5  ;;  %v676_v11 = vld [vmem:[#allocation3 + $0x28] sm:$0xff]   ;;  %v677_v12 = vld [vmem:[#allocation3 + $0x10] sm:$0xff]   ;;  %v679_v14 = vld [vmem:[#allocation3 + $0x18] sm:$0xff]  }
  0x2b   :  { %v678_v13 = vld [vmem:[#allocation3 + $0x30] sm:$0xff]   ;;  %v680_v15 = vld [vmem:[#allocation3 + $0x38] sm:$0xff]   ;;  %v516_v16 = vld [vmem:[%s828_s2] ss:$0 sm:$0xff]  ;;  %s757_s2 = smov [#allocation8]  }
  0x2c   :  { %615 = vmatpush3.bf16.msra.mxu0 %v666_v1  ;;  %653 = vmatpush3.bf16.msra.mxu1 %v666_v1  ;;  %s485_s11 = sshll.u32 %s757_s2, 4  ;;  %s486_s11 = int_to_ptr.vmem [resolvable:$true] %s485_s11 }
  0x2d   :  { %616 = vmatprep.subr.bf16.mxu0 %v667_v2  ;;  %646 = vmatprep.subr.bf16.mxu1 %v667_v2  ;;  %s725_s12 = scalar_lea.vmem %s486_s11, 1024  ;;  %p730_p3 = scmp.lt.s32.totalorder %s486_s11, %s486_s11 }
  0x2e   :  { %p726_p2 = scmp.ne.s32.totalorder %s486_s11, %s725_s12  ;;  %p731_p4 = scmp.lt.s32.totalorder %s725_s12, %s725_s12 }
  0x30   :  { %617 = vmatpush3.bf16.msra.mxu0 %v667_v2  ;;  %654 = vmatpush3.bf16.msra.mxu1 %v667_v2  ;;  %p732_p5 = por %p731_p4, %p730_p3 }
  0x31   :  { %618 = vmatprep.subr.bf16.mxu0 %v668_v3  ;;  %647 = vmatprep.subr.bf16.mxu1 %v668_v3 }
  0x32   :  { %p733_p6 = pnand %p732_p5, %p726_p2 }
  0x34   :  { %619 = vmatpush3.bf16.msra.mxu0 %v668_v3  ;;  %655 = vmatpush3.bf16.msra.mxu1 %v668_v3 }
  0x35   :  { %620 = vmatprep.subr.bf16.mxu0 %v669_v6  ;;  %648 = vmatprep.subr.bf16.mxu1 %v669_v6 }
  0x38   :  { %621 = vmatpush3.bf16.msra.mxu0 %v669_v6  ;;  %656 = vmatpush3.bf16.msra.mxu1 %v669_v6 }
  0x39   :  { %622 = vmatprep.subr.bf16.mxu0 %v670_v7  ;;  %649 = vmatprep.subr.bf16.mxu1 %v670_v7 }
  0x3c   :  { %623 = vmatpush3.bf16.msra.mxu0 %v670_v7  ;;  %657 = vmatpush3.bf16.msra.mxu1 %v670_v7 }
  0x3d   :  { %624 = vmatprep.subr.bf16.mxu0 %v671_v8  ;;  %650 = vmatprep.subr.bf16.mxu1 %v671_v8 }
  0x40   :  { %625 = vmatpush3.bf16.msra.mxu0 %v671_v8  ;;  %658 = vmatpush3.bf16.msra.mxu1 %v671_v8 }
  0x41   :  { %626 = vmatprep.subr.bf16.mxu0 %v672_v9  ;;  %651 = vmatprep.subr.bf16.mxu1 %v672_v9 }
  0x44   :  { %627 = vmatpush3.bf16.msra.mxu0 %v672_v9  ;;  %659 = vmatpush3.bf16.msra.mxu1 %v672_v9 }
  0x47   :  { %629 = vmatmul.mubr.bf16.vlgmr.msra.gmra.mrb[0].mxu0 %v675_v10  ;;  %637 = vmatmul.mubr.bf16.vlgmr.msra.gmra.mrb[0].mxu1 %v676_v11 }
  0x48   :  { %632 = vmatprep.mubr.bf16.mxu0 %v677_v12  ;;  %640 = vmatprep.mubr.bf16.mxu1 %v678_v13 }
  0x4f   :  { %633 = vmatmul.mubr.bf16.gmra.mrb[4].mxu0 %v679_v14  ;;  %641 = vmatmul.mubr.bf16.gmra.mrb[4].mxu1 %v680_v15 }
 0x11a   :  { %v630_v17 = vpop.f32.mrb[0].mxu0  ;;  %v638_v18 = vpop.f32.mrb[0].mxu1 }
 0x11b   :  { %v370_v19 = vadd.f32 %v630_v17, %v516_v16  ;;  %v378_v20 = vadd.f32 %v638_v18, %v516_v16  ;;  %v247_v21 = vpop.f32.mrb[1].mxu0  ;;  %v279_v22 = vpop.f32.mrb[1].mxu1 }
 0x11c   :  { %v368_v23 = vadd.f32 %v516_v16, %v247_v21  ;;  %v376_v24 = vadd.f32 %v516_v16, %v279_v22  ;;  %v631_v25 = vpop.f32.mrb[2].mxu0  ;;  %v639_v26 = vpop.f32.mrb[2].mxu1 }
 0x11d   :  { %v371_v27 = vadd.f32 %v631_v25, %v516_v16  ;;  %v379_v28 = vadd.f32 %v639_v26, %v516_v16  ;;  %v250_v29 = vpop.f32.mrb[3].mxu0  ;;  %v282_v30 = vpop.f32.mrb[3].mxu1  ;;  %v386_v33 = vmax.f32 %v370_v19, 0.0  ;;  %v394_v34 = vmax.f32 %v378_v20, 0.0 }
 0x11e   :  { %v369_v31 = vadd.f32 %v516_v16, %v250_v29  ;;  %v377_v32 = vadd.f32 %v516_v16, %v282_v30  ;;  %v384_v37 = vmax.f32 %v368_v23, 0.0  ;;  %v392_v38 = vmax.f32 %v376_v24, 0.0 }
 0x11f   :  { %v387_v35 = vmax.f32 %v371_v27, 0.0  ;;  %v395_v36 = vmax.f32 %v379_v28, 0.0 }
 0x120   :  { %v385_v39 = vmax.f32 %v369_v31, 0.0  ;;  %v393_v40 = vmax.f32 %v377_v32, 0.0 }
 0x121   :  { %v557_v41 = vpack.c.bf16 %v387_v35, %v386_v33  ;;  %v577_v42 = vpack.c.bf16 %v395_v36, %v394_v34 }
 0x122   :  { %v552_v43 = vpack.c.bf16 %v385_v39, %v384_v37  ;;  %v572_v44 = vpack.c.bf16 %v393_v40, %v392_v38  ;;  %v634_v45 = vpop.f32.mrb[4].mxu0  ;;  %v642_v46 = vpop.f32.mrb[4].mxu1 }
 0x123   :  { %589 = vst [vmem:[#allocation8 + $0x8] sm:$0xff] %v557_v41   ;;  %593 = vst [vmem:[#allocation8 + $0x28] sm:$0xff] %v577_v42   ;;  %v374_v47 = vadd.f32 %v634_v45, %v516_v16  ;;  %v382_v48 = vadd.f32 %v642_v46, %v516_v16  ;;  %v263_v49 = vpop.f32.mrb[5].mxu0  ;;  %v295_v50 = vpop.f32.mrb[5].mxu1 }
 0x124   :  { %553 = vst [vmem:[#allocation8] sm:$0xff] %v552_v43   ;;  %592 = vst [vmem:[#allocation8 + $0x20] sm:$0xff] %v572_v44   ;;  %v372_v51 = vadd.f32 %v516_v16, %v263_v49  ;;  %v380_v52 = vadd.f32 %v516_v16, %v295_v50  ;;  %v635_v53 = vpop.f32.mrb[6].mxu0  ;;  %v643_v54 = vpop.f32.mrb[6].mxu1 }
 0x125   :  { %v375_v55 = vadd.f32 %v635_v53, %v516_v16  ;;  %v383_v56 = vadd.f32 %v643_v54, %v516_v16  ;;  %v266_v57 = vpop.f32.mrb[7].mxu0  ;;  %v298_v58 = vpop.f32.mrb[7].mxu1  ;;  %v390_v61 = vmax.f32 %v374_v47, 0.0  ;;  %v398_v62 = vmax.f32 %v382_v48, 0.0 }
 0x126   :  { %v373_v59 = vadd.f32 %v516_v16, %v266_v57  ;;  %v381_v60 = vadd.f32 %v516_v16, %v298_v58  ;;  %v388_v1 = vmax.f32 %v372_v51, 0.0  ;;  %v396_v2 = vmax.f32 %v380_v52, 0.0 }
 0x127   :  { %v391_v63 = vmax.f32 %v375_v55, 0.0  ;;  %v399_v0 = vmax.f32 %v383_v56, 0.0 }
 0x128   :  { %v389_v3 = vmax.f32 %v373_v59, 0.0  ;;  %v397_v4 = vmax.f32 %v381_v60, 0.0 }
 0x129   :  { %v567_v5 = vpack.c.bf16 %v391_v63, %v390_v61  ;;  %v587_v6 = vpack.c.bf16 %v399_v0, %v398_v62 }
 0x12a   :  { %v562_v7 = vpack.c.bf16 %v389_v3, %v388_v1  ;;  %v582_v8 = vpack.c.bf16 %v397_v4, %v396_v2 }
 0x12b   :  { %591 = vst [vmem:[#allocation8 + $0x18] sm:$0xff] %v567_v5   ;;  %595 = vst [vmem:[#allocation8 + $0x38] sm:$0xff] %v587_v6  }
 0x12c   :  { %590 = vst [vmem:[#allocation8 + $0x10] sm:$0xff] %v562_v7   ;;  %594 = vst [vmem:[#allocation8 + $0x30] sm:$0xff] %v582_v8  }
 0x12d   :  { %736 = shalt.err (!%p733_p6)
}
 0x12e   :  { %s737_s15 = scalar_lea.hbm %s829_s3, 1024 }
 0x12f   :  { %p738_p7 = scmp.ne.s32.totalorder %s829_s3, %s737_s15  ;;  %p741_p8 = scmp.lt.u32.totalorder %s737_s15, %s829_s3 }
 0x131   :  { %p743_p9 = pnand %p741_p8, %p738_p7 }
 0x133   :  { %746 = shalt.err (!%p743_p9)
}
 0x134   :  { %491 = dma.vmem_to_hbm [thread:$0]  %s486_s11, 1024, %s829_s3, [#allocation5], %s754_s22, %s754_s22, %s755_s23  }
 0x135   :  { %751 = dma.done.wait [#allocation5], 1024  }
 0x136   :  { %752 = vsyncadd [#allocation5], 4294966272 }
 0x137   :  { %495 = vsyncpa [#allocation4], 1 }
 0x138   :  { %496 = vsyncpa [#allocation7], 1 }
 0x139   :  { %497 = vsyncpa [#allocation5], 1 }

</bundles_post_ra>
